<compile_context>
chip_gen: v6e
topology: v6e:2x2x1
jax: 0.10.0
libtpu: 0.0.40
codegen_flags: <defaults>
</compile_context>

<pallas_src>
import functools

import jax
import jax.numpy as jnp
from jax import lax
from jax.experimental import pallas as pl
from jax.experimental.pallas import tpu as pltpu

_LANE = 128


def _round_up(x, m):
    return ((x + m - 1) // m) * m


def _pow(x, degree):
    if isinstance(degree, int):
        return lax.integer_pow(x, degree)          # VPU multiplies, hide under MXU/DMA
    # TODO(synk): non-integer degree with a negative base yields NaN (matches torch.pow).
    return jnp.power(x, jnp.float32(degree))       # EUP log/exp path


def _norm_poly_tile_kernel(x_ref, y_ref, nx_ref, ny_ref, o_ref, *, degree, c2):
    # x_ref : (TN, D)   tile of X^T                       (input dtype)
    # y_ref : (D, TM)   tile of Y, natural (D, M) layout  (input dtype)
    # nx_ref: (TN, 1)   rsqrt(|x_i|^2 + c^2)              (f32)
    # ny_ref: (1, TM)   rsqrt(|y_j|^2 + c^2)              (f32)
    # o_ref : (TN, TM)  output tile                       (input dtype)
    gram = jnp.dot(x_ref[...], y_ref[...], preferred_element_type=jnp.float32)
    # Normalize before the pow: |base| <= 1 by Cauchy-Schwarz on (x, c), (y, c),
    # so integer_pow cannot overflow and the narrow store is safe.
    base = (gram + c2) * nx_ref[...] * ny_ref[...]
    o_ref[...] = _pow(base, degree).astype(o_ref.dtype)   # f32 math, cast at store


def norm_poly_kernel(X, Y=None, *, degree=2, t=1.0, tile_n=512, tile_m=1024,
                     vmem_budget_bytes=40 * 1024 * 1024):
    """X: (D, N), Y: (D, M) -> (N, M) normalized polynomial kernel matrix."""
    if Y is None:
        Y = X

    # Integral degrees (including 2.0, 3.0, ...) take the integer_pow path.
    if isinstance(degree, float) and float(degree).is_integer():
        degree = int(degree)
    c2 = float(t) ** 2

    D, N = X.shape
    D2, M = Y.shape
    assert D == D2, "feature dims of X and Y must match"

    in_dtype = jnp.result_type(X.dtype, Y.dtype)
    out_dtype = in_dtype                       # store output in the input dtype
    in_itemsize = jnp.dtype(in_dtype).itemsize
    out_itemsize = jnp.dtype(out_dtype).itemsize
    sublane = max(8, 32 // in_itemsize)        # 8 f32, 16 bf16, 32 int8/fp8

    # ---- Hoisted normalizers (once, f32, on the original (D, .) layout) -------
    sx = jnp.sum(jnp.square(X.astype(jnp.float32)), axis=0) + c2   # (N,)
    sy = jnp.sum(jnp.square(Y.astype(jnp.float32)), axis=0) + c2   # (M,)
    nx = lax.rsqrt(sx).reshape(N, 1)                               # (N, 1)
    ny = lax.rsqrt(sy).reshape(1, M)                               # (1, M)

    # MXU-friendly operand layouts: X^T once (contraction dim D on lanes for the
    # LHS); Y stays in its natural (D, M) layout (contraction on sublanes for RHS).
    Xt = X.T.astype(in_dtype)   # (N, D)
    Yn = Y.astype(in_dtype)     # (D, M)

    # ---- Tiling (no padded copies; ragged tail blocks handled by Pallas) ------
    tile_n = _round_up(min(tile_n, _round_up(N, sublane)), sublane)
    tile_m = _round_up(min(tile_m, _round_up(M, _LANE)), _LANE)

    def block_bytes(tn, tm):
        x_blk = tn * _round_up(D, _LANE) * in_itemsize
        y_blk = _round_up(D, sublane) * tm * in_itemsize
        nx_blk = tn * _LANE * 4
        ny_blk = 8 * tm * 4
        o_blk = tn * tm * out_itemsize
        return x_blk + y_blk + nx_blk + ny_blk + o_blk

    # v7x-safe VMEM guard (64 MiB physical): shrink tiles until the
    # double-buffered block set fits the budget.
    while 2 * block_bytes(tile_n, tile_m) > vmem_budget_bytes:
        if tile_n > sublane:
            tile_n = _round_up(max(tile_n // 2, sublane), sublane)
        elif tile_m > _LANE:
            tile_m = _round_up(max(tile_m // 2, _LANE), _LANE)
        else:
            break  # TODO(synk): add a K grid axis + f32 VMEM accumulator for huge D

    grid_n = pl.cdiv(N, tile_n)
    grid_m = pl.cdiv(M, tile_m)

    # v7x has 2 TensorCores: make sure at least one parallel axis has >= 2 blocks.
    if grid_n == 1 and grid_m == 1:
        if tile_m >= 2 * _LANE:
            tile_m = _round_up(tile_m // 2, _LANE)
        elif tile_n >= 2 * sublane:
            tile_n = _round_up(tile_n // 2, sublane)
        grid_n = pl.cdiv(N, tile_n)
        grid_m = pl.cdiv(M, tile_m)

    vmem_limit = int(min(2 * block_bytes(tile_n, tile_m) + 8 * 1024 * 1024,
                         60 * 1024 * 1024))

    cost = pl.CostEstimate(
        flops=2 * N * M * D + 4 * N * M,
        transcendentals=0 if isinstance(degree, int) else N * M,
        bytes_accessed=(N * D * in_itemsize                 # X^T read once
                        + D * M * in_itemsize * grid_n      # Y re-read per row tile
                        + N * M * out_itemsize              # output write
                        + (N + M) * 4),                     # normalizers
    )

    kernel = functools.partial(_norm_poly_tile_kernel, degree=degree, c2=c2)

    out = pl.pallas_call(
        kernel,
        out_shape=jax.ShapeDtypeStruct((N, M), out_dtype),
        grid_spec=pltpu.PrefetchScalarGridSpec(
            num_scalar_prefetch=0,
            grid=(grid_n, grid_m),
            in_specs=[
                pl.BlockSpec((tile_n, D), lambda i, j: (i, 0)),   # X^T row tile
                pl.BlockSpec((D, tile_m), lambda i, j: (0, j)),   # Y col tile (natural layout)
                pl.BlockSpec((tile_n, 1), lambda i, j: (i, 0)),   # row normalizer
                pl.BlockSpec((1, tile_m), lambda i, j: (0, j)),   # col normalizer
            ],
            out_specs=pl.BlockSpec((tile_n, tile_m), lambda i, j: (i, j)),
        ),
        compiler_params=pltpu.CompilerParams(
            dimension_semantics=("parallel", "parallel"),
            vmem_limit_bytes=vmem_limit,
        ),
        cost_estimate=cost,
    )(Xt, Yn, nx, ny)

    return out


def _reference(X, Y, degree, t):
    # Pure-JAX reference mirroring the torch module exactly.
    c2 = t ** 2
    Xt = X.T.astype(jnp.float32)
    Yt = Y.T.astype(jnp.float32)
    d1 = 1.0 / jnp.sqrt((jnp.sum(Xt ** 2, axis=1) + c2) ** degree)
    d2 = 1.0 / jnp.sqrt((jnp.sum(Yt ** 2, axis=1) + c2) ** degree)
    core = (Xt @ Yt.T + c2) ** degree
    return (d1[:, None] * core) * d2[None, :]


if __name__ == "__main__":
    key = jax.random.PRNGKey(0)
    kx, ky = jax.random.split(key)

    # X: (D, N), Y: (D, M) — ragged N/M exercise the ragged-tail tiling path.
    D_feat, N, M = 96, 300, 200
    degree, t = 3, 1.5                     # NormPolyKernelTorch(d=3, t=1.5)

    X = jax.random.normal(kx, (D_feat, N), dtype=jnp.float32)
    Y = jax.random.normal(ky, (D_feat, M), dtype=jnp.float32)

    out = norm_poly_kernel(X, Y, degree=degree, t=t)
    out = jax.block_until_ready(out)

    ref = _reference(X, Y, degree, t)
    assert out.shape == (N, M)
    max_diff = jnp.max(jnp.abs(out.astype(jnp.float32) - ref))
    assert jnp.allclose(out.astype(jnp.float32), ref, rtol=1e-3, atol=1e-3), \
        f"max abs diff {max_diff}"

    print("KERNEL_OK")
</pallas_src>

<mosaic_0001>
module attributes {stable_mosaic.version = 11 : i64} {
  func.func @_norm_poly_tile_kernel(%arg0: i32, %arg1: i32, %arg2: memref<304x96xf32, #tpu.memory_space<vmem>>, %arg3: memref<96x128xf32, #tpu.memory_space<vmem>>, %arg4: memref<304x1xf32, #tpu.memory_space<vmem>>, %arg5: memref<1x128xf32, #tpu.memory_space<vmem>>, %arg6: memref<304x128xf32, #tpu.memory_space<vmem>>) attributes {dimension_semantics = [#tpu.dimension_semantics<parallel>, #tpu.dimension_semantics<parallel>], iteration_bounds = array<i64: 1, 2>, scalar_prefetch = 0 : i64, scratch_operands = 0 : i64, tpu.core_type = #tpu.core_type<tc>, window_params = [{transform_indices = @transform_0, window_bounds = array<i64: 304, 96>}, {transform_indices = @transform_1, window_bounds = array<i64: 96, 128>}, {transform_indices = @transform_2, window_bounds = array<i64: 304, 1>}, {transform_indices = @transform_3, window_bounds = array<i64: 1, 128>}, {transform_indices = @transform_4, window_bounds = array<i64: 304, 128>}]} {
    %c0 = arith.constant 0 : index
    %c0_0 = arith.constant 0 : index
    %0 = vector.load %arg2[%c0, %c0_0] : memref<304x96xf32, #tpu.memory_space<vmem>>, vector<304x96xf32>
    %c0_1 = arith.constant 0 : index
    %c0_2 = arith.constant 0 : index
    %1 = vector.load %arg3[%c0_1, %c0_2] : memref<96x128xf32, #tpu.memory_space<vmem>>, vector<96x128xf32>
    %cst = arith.constant dense<0.000000e+00> : vector<304x128xf32>
    %2 = tpu.matmul %0, %1, %cst {dimension_numbers = #tpu.dot_dimension_numbers<[1], [0], [0], [1], [0, 0, 1, 1], [], []>} : vector<304x96xf32>, vector<96x128xf32>, vector<304x128xf32> -> vector<304x128xf32>
    %cst_3 = arith.constant 2.250000e+00 : f32
    %3 = vector.broadcast %cst_3 : f32 to vector<304x128xf32>
    %4 = arith.addf %2, %3 : vector<304x128xf32>
    %c0_4 = arith.constant 0 : index
    %c0_5 = arith.constant 0 : index
    %5 = vector.load %arg4[%c0_4, %c0_5] : memref<304x1xf32, #tpu.memory_space<vmem>>, vector<304x1xf32>
    %6 = vector.broadcast %5 : vector<304x1xf32> to vector<304x128xf32>
    %7 = arith.mulf %4, %6 : vector<304x128xf32>
    %c0_6 = arith.constant 0 : index
    %c0_7 = arith.constant 0 : index
    %8 = vector.load %arg5[%c0_6, %c0_7] : memref<1x128xf32, #tpu.memory_space<vmem>>, vector<1x128xf32>
    %9 = vector.broadcast %8 : vector<1x128xf32> to vector<304x128xf32>
    %10 = arith.mulf %7, %9 : vector<304x128xf32>
    %11 = arith.mulf %10, %10 : vector<304x128xf32>
    %12 = arith.mulf %10, %11 : vector<304x128xf32>
    %c0_8 = arith.constant 0 : index
    %c0_9 = arith.constant 0 : index
    %13 = vector.load %arg6[%c0_8, %c0_9] : memref<304x128xf32, #tpu.memory_space<vmem>>, vector<304x128xf32>
    tpu.vector_store %arg6[%c0_8, %c0_9], %12 {strides = array<i32>} : memref<304x128xf32, #tpu.memory_space<vmem>>, vector<304x128xf32>,
    return
  }
  func.func @transform_0(%arg0: i32, %arg1: i32) -> (i32, i32) {
    %c0_i32 = arith.constant 0 : i32
    %c0_i32_0 = arith.constant 0 : i32
    return %arg0, %c0_i32 : i32, i32
  }
  func.func @transform_1(%arg0: i32, %arg1: i32) -> (i32, i32) {
    %c0_i32 = arith.constant 0 : i32
    %c0_i32_0 = arith.constant 0 : i32
    return %c0_i32, %arg1 : i32, i32
  }
  func.func @transform_2(%arg0: i32, %arg1: i32) -> (i32, i32) {
    %c0_i32 = arith.constant 0 : i32
    %c0_i32_0 = arith.constant 0 : i32
    return %arg0, %c0_i32 : i32, i32
  }
  func.func @transform_3(%arg0: i32, %arg1: i32) -> (i32, i32) {
    %c0_i32 = arith.constant 0 : i32
    %c0_i32_0 = arith.constant 0 : i32
    return %c0_i32, %arg1 : i32, i32
  }
  func.func @transform_4(%arg0: i32, %arg1: i32) -> (i32, i32) {
    %c0_i32 = arith.constant 0 : i32
    return %arg0, %arg1 : i32, i32
  }
}

</mosaic_0001>

<bundles_post_ra>
// kernel: tpu_custom_call.1
= control target key start
LH: loop header
LB: loop body
LE: loop exit
PB: predicated region body
PF: predicated region fallthrough
CT: control target
= control target key end

     0   :  { %s1805_s15 = smov 0   ;;  %s1807_s16 = smov 0   ;;  %s2378_s0 = inlined_call_operand.vmem [shape: f32[300,96], index: 0, kind: input, shape index: {}]   ;;  %s2379_s1 = inlined_call_operand.vmem [shape: f32[96,200], index: 1, kind: input, shape index: {}]   ;;  %s2380_s2 = inlined_call_operand.vmem [shape: f32[300,1], index: 2, kind: input, shape index: {}]   ;;  %s2381_s3 = inlined_call_operand.vmem [shape: f32[1,200], index: 3, kind: input, shape index: {}]   ;;  %s2382_s4 = inlined_call_operand.vmem [shape: f32[300,200], index: 4, kind: output, shape index: {}]  }
   0x1   :  { %s1809_s17 = smov 0   ;;  %s1811_s18 = smov 0  }
   0x2   :  { %s1813_s19 = smov 0  }
   0x3 LB: > { %s23_s20 = sadd.s32 1, %s1773_s18  ;;  %s1488_s21 = sadd.s32 4294967295, %s1777_s19   ;;  %s1777_s19 = sphi %s1813_s19, %s14_s19   ;;  %s1773_s18 = sphi %s1811_s18, %s2387_s18   ;;  %s1769_s17 = sphi %s1809_s17, %s2386_s17   ;;  %s1765_s16 = sphi %s1807_s16, %s2385_s16   ;;  %s1761_s15 = sphi %s1805_s15, %s2384_s15  }
   0x4   : > { %p24_p0 = scmp.ge.s32.totalorder %s23_s20, 2  ;;  %p66_p1 = scmp.ne.s32.totalorder %s1765_s16, %s1761_s15 }
   0x5   : > { %p67_p2 = scmp.eq.s32.totalorder %s1777_s19, 0  ;;  %p150_p4 = scmp.eq.s32.totalorder %s1488_s21, 1 }
   0x6   : > { %s2389_s20 = smov (%p24_p0, %s23_s20), 0  ;;  %s59_s23 = sadd.s32 1, %s1765_s16 }
   0x7   : > { %p68_p3 = por %p67_p2, %p66_p1  ;;  %s56_s22 = ssub.s32 %s1773_s18, %s2389_s20 }
   0x8   : > { %p57_p5 = scmp.eq.s32.totalorder %s56_s22, 0  ;;  %p1840_p6 = por %p150_p4, %p66_p1 }
   0x9   : > { %p1493_p7 = scmp.ge.s32.totalorder %s1777_s19, 2 }
   0xa   : > { %s1845_s25 = scalar_select %p57_p5, %s1765_s16, %s59_s23  }
   0xb   : > { %190 = sbr.rel (%p1493_p7) target bundleno = 26 (0x1a), region = 24 }
  0x10   : > { %193 = sbr.rel (!%p68_p3) target bundleno = 26 (0x1a), region = 28  ;;  %s195_s26 = sand.u32 (%p68_p3), 1, %s1765_s16  }
  0x11   : > { %s1494_s27 = sshll.u32 (%p68_p3), %s1773_s18, 3  ;;  %s1693_s28 = smul.u32 (%p68_p3), 96, %s195_s26 }
  0x12   : > { %s199_s5 = scalar_lea.vmem (%p68_p3), %s2379_s1, %s1494_s27 }
  0x13   : > { %v250_v0 = vld [vmem:[%s199_s5] sm:$0xff] (%p68_p3)  ;;  %v252_v1 = vld [vmem:[%s199_s5 + $0x10] sm:$0xff] (%p68_p3)  ;;  %s197_s6 = scalar_lea.vmem (%p68_p3), [#allocation2], %s1693_s28 }
  0x14   : > { %v254_v2 = vld [vmem:[%s199_s5 + $0x20] sm:$0xff] (%p68_p3)  ;;  %v256_v3 = vld [vmem:[%s199_s5 + $0x30] sm:$0xff] (%p68_p3)  ;;  %251 = vst [vmem:[%s197_s6] sm:$0xff] (%p68_p3), %v250_v0  ;;  %253 = vst [vmem:[%s197_s6 + $0x8] sm:$0xff] (%p68_p3), %v252_v1 }
  0x15   : > { %v258_v4 = vld [vmem:[%s199_s5 + $0x40] sm:$0xff]  ;;  %v260_v5 = vld [vmem:[%s199_s5 + $0x50] sm:$0xff]  ;;  %255 = vst [vmem:[%s197_s6 + $0x10] sm:$0xff] %v254_v2  ;;  %257 = vst [vmem:[%s197_s6 + $0x18] sm:$0xff] %v256_v3 }
  0x16   : > { %259 = vst [vmem:[%s197_s6 + $0x20] sm:$0xff] %v258_v4  ;;  %261 = vst [vmem:[%s197_s6 + $0x28] sm:$0xff] %v260_v5  ;;  %v262_v6 = vld [vmem:[%s199_s5 + $0x60] sm:$0xff]  ;;  %v264_v7 = vld [vmem:[%s199_s5 + $0x70] sm:$0xff] }
  0x17   : > { %v266_v8 = vld [vmem:[%s199_s5 + $0x80] sm:$0xff]  ;;  %263 = vst [vmem:[%s197_s6 + $0x30] sm:$0xff] %v262_v6  ;;  %265 = vst [vmem:[%s197_s6 + $0x38] sm:$0xff] %v264_v7  ;;  %v268_v9 = vld [vmem:[%s199_s5 + $0x90] sm:$0xff] }
  0x18   : > { %267 = vst [vmem:[%s197_s6 + $0x40] sm:$0xff] %v266_v8  ;;  %v270_v10 = vld [vmem:[%s199_s5 + $0xa0] sm:$0xff]  ;;  %v272_v11 = vld [vmem:[%s199_s5 + $0xb0] sm:$0xff]  ;;  %269 = vst [vmem:[%s197_s6 + $0x48] sm:$0xff] %v268_v9 }
  0x19   : > { %271 = vst [vmem:[%s197_s6 + $0x50] sm:$0xff] %v270_v10  ;;  %273 = vst [vmem:[%s197_s6 + $0x58] sm:$0xff] %v272_v11 }
  0x1a PF: > { %p1495_p8 = scmp.ge.s32.totalorder %s1777_s19, 1  ;;  %p284_p9 = scmp.lt.s32.totalorder %s1777_s19, 3 }
  0x1c   : > { %p285_p10 = pnand %p1495_p8, %p284_p9 }
  0x1d   : > { %s291_s11 = sand.u32 (!%p285_p10), 1, %s1761_s15   ;;  %p340_p11 = scmp.lt.s32.totalorder (!%p285_p10), %s1769_s17, 1 }
  0x1e   : > { %288 = sbr.rel (%p285_p10) target bundleno = 330 (0x14a), region = 70 }
  0x1f   : > { %s1694_s12 = smul.u32 (!%p285_p10), 96, %s291_s11 }
  0x20   : > { %s2181_s13 = smul.u32 (!%p285_p10), 304, %s291_s11 }
  0x21   : > { %s1870_s23 = scalar_lea.vmem (!%p285_p10), [#allocation2], %s1694_s12 }
  0x22   : > { %s2191_s15 = scalar_lea.vmem (!%p285_p10), [#allocation3], %s2181_s13 }
  0x23   : > { %v766_v12 = vld [vmem:[%s2380_s2 + $0x10] sm:$0xff]  ;;  %v764_v13 = vld [vmem:[%s2380_s2] sm:$0xff]  ;;  %v1779_v14 = vmov 0   ;;  %v767_v15 = vld [vmem:[%s2380_s2 + $0x18] sm:$0xff]  ;;  %vm394_vm0 = vcmask 785408   ;;  %s341_s9 = scalar_select %p340_p11, %s1769_s17, 1 }
  0x24   : > { %1738 = vset.pattern.permute.xlu1 %v1779_v14  ;;  %1737 = vset.pattern.permute.xlu0 %v1779_v14  ;;  %v765_v16 = vld [vmem:[%s2380_s2 + $0x8] sm:$0xff]  ;;  %v393_v17 = vld [vmem:[%s1870_s23 + $0x58] sm:$0xff]  ;;  %v392_v18 = vld [vmem:[%s1870_s23 + $0x50] sm:$0xff]  ;;  %s1535_s11 = sshll.u32 (%p1840_p6), %s1769_s17, 3 }
  0x25   : > { %814 = vperm.xlu1 %1738, %v766_v12   ;;  %804 = vperm.xlu0 %1737, %v764_v13   ;;  %v391_v19 = vld [vmem:[%s1870_s23 + $0x48] sm:$0xff]  ;;  %v768_v21 = vld [vmem:[%s2380_s2 + $0x20] sm:$0xff]  ;;  %v389_v23 = vld [vmem:[%s1870_s23 + $0x38] sm:$0xff]  ;;  %s342_s12 = scalar_lea.vmem %s2381_s3, %s341_s9  ;;  %s2288_s22 = scalar_lea.vmem (%p1840_p6), %s2382_s4, %s1535_s11 }
  0x26   : > { %1588 = vmatprep.subr.mxu0 %v393_v17  ;;  %1669 = vmatprep.subr.mxu1 %v393_v17  ;;  %v769_v20 = vld [vmem:[%s2380_s2 + $0x28] sm:$0xff]  ;;  %v390_v22 = vld [vmem:[%s1870_s23 + $0x40] sm:$0xff]  ;;  %v771_v24 = vld [vmem:[%s2380_s2 + $0x38] sm:$0xff] }
  0x27   : > { %1589 = vmatpush3.msra.mxu0 %v393_v17  ;;  %1681 = vmatpush3.msra.mxu1 %v393_v17  ;;  %v770_v25 = vld [vmem:[%s2380_s2 + $0x30] sm:$0xff]  ;;  %v387_v27 = vld [vmem:[%s1870_s23 + $0x28] sm:$0xff]  ;;  %v772_v29 = vld [vmem:[%s2380_s2 + $0x40] sm:$0xff] }
  0x28   : > { %1590 = vmatprep.subr.mxu0 %v392_v18  ;;  %1670 = vmatprep.subr.mxu1 %v392_v18  ;;  %v388_v26 = vld [vmem:[%s1870_s23 + $0x30] sm:$0xff]  ;;  %v773_v28 = vld [vmem:[%s2380_s2 + $0x48] sm:$0xff]  ;;  %v386_v30 = vld [vmem:[%s1870_s23 + $0x20] sm:$0xff] }
  0x29   : > { %819 = vperm.xlu1 %1738, %v767_v15   ;;  %809 = vperm.xlu0 %1737, %v765_v16   ;;  %v385_v31 = vld [vmem:[%s1870_s23 + $0x18] sm:$0xff]  ;;  %v774_v33 = vld [vmem:[%s2380_s2 + $0x50] sm:$0xff]  ;;  %v383_v35 = vld [vmem:[%s1870_s23 + $0x8] sm:$0xff] }
  0x2a   : > { %1591 = vmatpush3.msra.mxu0 %v392_v18  ;;  %1682 = vmatpush3.msra.mxu1 %v392_v18  ;;  %v775_v32 = vld [vmem:[%s2380_s2 + $0x58] sm:$0xff]  ;;  %v384_v34 = vld [vmem:[%s1870_s23 + $0x10] sm:$0xff]  ;;  %v777_v36 = vld [vmem:[%s2380_s2 + $0x68] sm:$0xff] }
  0x2b   : > { %1592 = vmatprep.subr.mxu0 %v391_v19  ;;  %1671 = vmatprep.subr.mxu1 %v391_v19  ;;  %v776_v37 = vld [vmem:[%s2380_s2 + $0x60] sm:$0xff]  ;;  %v345_v41 = vld [vmem:[%s2378_s0 + $0x8] sm:$0xff]  ;;  %v779_v43 = vld [vmem:[%s2380_s2 + $0x78] sm:$0xff] }
  0x2c   : > { %1593 = vmatpush3.msra.mxu0 %v391_v19  ;;  %1683 = vmatpush3.msra.mxu1 %v391_v19  ;;  %v382_v38 = vld [vmem:[%s1870_s23] sm:$0xff]  ;;  %v365_v42 = vld [vmem:[%s2378_s0 + $0xa8] sm:$0xff]  ;;  %v778_v44 = vld [vmem:[%s2380_s2 + $0x70] sm:$0xff] }
  0x2d   : > { %829 = vperm.xlu1 %1738, %v769_v20   ;;  %824 = vperm.xlu0 %1737, %v768_v21   ;;  %v344_v39 = vld [vmem:[%s2378_s0] sm:$0xff]  ;;  %v346_v45 = vld [vmem:[%s2378_s0 + $0x10] sm:$0xff]  ;;  %v347_v47 = vld [vmem:[%s2378_s0 + $0x18] sm:$0xff] }
  0x2e   : > { %1594 = vmatprep.subr.mxu0 %v390_v22  ;;  %1672 = vmatprep.subr.mxu1 %v390_v22  ;;  %v364_v40 = vld [vmem:[%s2378_s0 + $0xa0] sm:$0xff]  ;;  %v366_v46 = vld [vmem:[%s2378_s0 + $0xb0] sm:$0xff]  ;;  %v367_v48 = vld [vmem:[%s2378_s0 + $0xb8] sm:$0xff] }
  0x2f   : > { %1595 = vmatpush3.msra.mxu0 %v390_v22  ;;  %1684 = vmatpush3.msra.mxu1 %v390_v22  ;;  %v781_v49 = vld [vmem:[%s2380_s2 + $0x88] sm:$0xff]  ;;  %v780_v50 = vld [vmem:[%s2380_s2 + $0x80] sm:$0xff]  ;;  %v783_v55 = vld [vmem:[%s2380_s2 + $0x98] sm:$0xff] }
  0x30   : > { %1596 = vmatprep.subr.mxu0 %v389_v23  ;;  %1673 = vmatprep.subr.mxu1 %v389_v23  ;;  %v348_v51 = vld [vmem:[%s2378_s0 + $0x20] sm:$0xff]  ;;  %v349_v53 = vld [vmem:[%s2378_s0 + $0x28] sm:$0xff]  ;;  %v782_v56 = vld [vmem:[%s2380_s2 + $0x90] sm:$0xff] }
  0x31   : > { %839 = vperm.xlu1 %1738, %v771_v24   ;;  %834 = vperm.xlu0 %1737, %v770_v25   ;;  %v368_v52 = vld [vmem:[%s2378_s0 + $0xc0] sm:$0xff]  ;;  %v369_v54 = vld [vmem:[%s2378_s0 + $0xc8] sm:$0xff]  ;;  %v350_v57 = vld [vmem:[%s2378_s0 + $0x30] sm:$0xff] }
  0x32   : > { %1597 = vmatpush3.msra.mxu0 %v389_v23  ;;  %1685 = vmatpush3.msra.mxu1 %v389_v23  ;;  %v370_v58 = vld [vmem:[%s2378_s0 + $0xd0] sm:$0xff]  ;;  %v351_v59 = vld [vmem:[%s2378_s0 + $0x38] sm:$0xff]  ;;  %v785_v61 = vld [vmem:[%s2380_s2 + $0xa8] sm:$0xff] }
  0x33   : > { %1598 = vmatprep.subr.mxu0 %v388_v26  ;;  %1674 = vmatprep.subr.mxu1 %v388_v26  ;;  %v371_v60 = vld [vmem:[%s2378_s0 + $0xd8] sm:$0xff]  ;;  %v784_v62 = vld [vmem:[%s2380_s2 + $0xa0] sm:$0xff]  ;;  %v353_v1 = vld [vmem:[%s2378_s0 + $0x48] sm:$0xff] }
  0x34   : > { %1599 = vmatpush3.msra.mxu0 %v388_v26  ;;  %1686 = vmatpush3.msra.mxu1 %v388_v26  ;;  %v352_v63 = vld [vmem:[%s2378_s0 + $0x40] sm:$0xff]  ;;  %v373_v2 = vld [vmem:[%s2378_s0 + $0xe8] sm:$0xff]  ;;  %v787_v3 = vld [vmem:[%s2380_s2 + $0xb8] sm:$0xff] }
  0x35   : > { %1600 = vmatprep.subr.mxu0 %v387_v27  ;;  %1675 = vmatprep.subr.mxu1 %v387_v27  ;;  %v372_v0 = vld [vmem:[%s2378_s0 + $0xe0] sm:$0xff]  ;;  %v786_v4 = vld [vmem:[%s2380_s2 + $0xb0] sm:$0xff]  ;;  %v355_v7 = vld [vmem:[%s2378_s0 + $0x58] sm:$0xff] }
  0x36   : > { %849 = vperm.xlu1 %1738, %v773_v28   ;;  %844 = vperm.xlu0 %1737, %v772_v29   ;;  %v354_v5 = vld [vmem:[%s2378_s0 + $0x50] sm:$0xff]  ;;  %v375_v8 = vld [vmem:[%s2378_s0 + $0xf8] sm:$0xff]  ;;  %v789_v9 = vld [vmem:[%s2380_s2 + $0xc8] sm:$0xff] }
  0x37   : > { %1601 = vmatpush3.msra.mxu0 %v387_v27  ;;  %1687 = vmatpush3.msra.mxu1 %v387_v27  ;;  %v374_v6 = vld [vmem:[%s2378_s0 + $0xf0] sm:$0xff]  ;;  %v788_v10 = vld [vmem:[%s2380_s2 + $0xc0] sm:$0xff]  ;;  %v357_v13 = vld [vmem:[%s2378_s0 + $0x68] sm:$0xff] }
  0x38   : > { %1602 = vmatprep.subr.mxu0 %v386_v30  ;;  %1676 = vmatprep.subr.mxu1 %v386_v30  ;;  %v356_v11 = vld [vmem:[%s2378_s0 + $0x60] sm:$0xff]  ;;  %v377_v14 = vld [vmem:[%s2378_s0 + $0x108] sm:$0xff]  ;;  %v791_v15 = vld [vmem:[%s2380_s2 + $0xd8] sm:$0xff] }
  0x39   : > { %1603 = vmatpush3.msra.mxu0 %v386_v30  ;;  %1688 = vmatpush3.msra.mxu1 %v386_v30  ;;  %v376_v12 = vld [vmem:[%s2378_s0 + $0x100] sm:$0xff]  ;;  %v790_v16 = vld [vmem:[%s2380_s2 + $0xd0] sm:$0xff]  ;;  %v359_v19 = vld [vmem:[%s2378_s0 + $0x78] sm:$0xff] }
  0x3a   : > { %1604 = vmatprep.subr.mxu0 %v385_v31  ;;  %1677 = vmatprep.subr.mxu1 %v385_v31  ;;  %v358_v17 = vld [vmem:[%s2378_s0 + $0x70] sm:$0xff]  ;;  %v379_v20 = vld [vmem:[%s2378_s0 + $0x118] sm:$0xff]  ;;  %v793_v21 = vld [vmem:[%s2380_s2 + $0xe8] sm:$0xff] }
  0x3b   : > { %859 = vperm.xlu1 %1738, %v775_v32   ;;  %854 = vperm.xlu0 %1737, %v774_v33   ;;  %v378_v18 = vld [vmem:[%s2378_s0 + $0x110] sm:$0xff]  ;;  %v792_v22 = vld [vmem:[%s2380_s2 + $0xe0] sm:$0xff]  ;;  %v361_v25 = vld [vmem:[%s2378_s0 + $0x88] sm:$0xff] }
  0x3c   : > { %1605 = vmatpush3.msra.mxu0 %v385_v31  ;;  %1689 = vmatpush3.msra.mxu1 %v385_v31  ;;  %v360_v23 = vld [vmem:[%s2378_s0 + $0x80] sm:$0xff]  ;;  %v381_v26 = vld [vmem:[%s2378_s0 + $0x128] sm:$0xff]  ;;  %v795_v27 = vld [vmem:[%s2380_s2 + $0xf8] sm:$0xff] }
  0x3d   : > { %1606 = vmatprep.subr.mxu0 %v384_v34  ;;  %1678 = vmatprep.subr.mxu1 %v384_v34  ;;  %v380_v24 = vld [vmem:[%s2378_s0 + $0x120] sm:$0xff]  ;;  %v794_v28 = vld [vmem:[%s2380_s2 + $0xf0] sm:$0xff]  ;;  %v363_v30 = vld [vmem:[%s2378_s0 + $0x98] sm:$0xff] }
  0x3e   : > { %1607 = vmatpush3.msra.mxu0 %v384_v34  ;;  %1690 = vmatpush3.msra.mxu1 %v384_v34  ;;  %v362_v29 = vld [vmem:[%s2378_s0 + $0x90] sm:$0xff]  ;;  %v797_v31 = vld [vmem:[%s2380_s2 + $0x108] sm:$0xff]  ;;  %v796_v32 = vld [vmem:[%s2380_s2 + $0x100] sm:$0xff] }
  0x3f   : > { %1608 = vmatprep.subr.mxu0 %v383_v35  ;;  %1679 = vmatprep.subr.mxu1 %v383_v35  ;;  %v799_v33 = vld [vmem:[%s2380_s2 + $0x118] sm:$0xff]  ;;  %v798_v34 = vld [vmem:[%s2380_s2 + $0x110] sm:$0xff] }
  0x40   : > { %869 = vperm.xlu1 %1738, %v777_v36   ;;  %864 = vperm.xlu0 %1737, %v776_v37   ;;  %v800_v36 = vld [vmem:[%s2380_s2 + $0x120] sm:$0xff] }
  0x41   : > { %1609 = vmatpush3.msra.mxu0 %v383_v35  ;;  %1691 = vmatpush3.msra.mxu1 %v383_v35  ;;  %v801_v35 = vld [vmem:[%s2380_s2 + $0x128] sm:$0xff] }
  0x42   : > { %1610 = vmatprep.subr.mxu0 %v382_v38  ;;  %1680 = vmatprep.subr.mxu1 %v382_v38 }
  0x43   : > { %1611 = vmatpush3.msra.mxu0 %v382_v38  ;;  %1692 = vmatpush3.msra.mxu1 %v382_v38 }
  0x44   : > { %1612 = vmatprep.mubr.msk.f32.mxu0 %vm394_vm0, %v344_v39  ;;  %1642 = vmatprep.mubr.msk.f32.mxu1 %vm394_vm0, %v364_v40 }
  0x45   : > { %1613 = vmatmul.mubr.msk.f32.vlgmr.msra.gmra.mxu0 %vm394_vm0, %v345_v41  ;;  %1643 = vmatmul.mubr.msk.f32.vlgmr.msra.gmra.mxu1 %vm394_vm0, %v365_v42 }
  0x46   : > { %879 = vperm.xlu1 %1738, %v779_v43   ;;  %874 = vperm.xlu0 %1737, %v778_v44  }
  0x47   : > { %1615 = vmatprep.mubr.msk.f32.mxu0 %vm394_vm0, %v346_v45  ;;  %1645 = vmatprep.mubr.msk.f32.mxu1 %vm394_vm0, %v366_v46 }
  0x49   : > { %1616 = vmatmul.mubr.msk.f32.gmra.mxu0 %vm394_vm0, %v347_v47  ;;  %1646 = vmatmul.mubr.msk.f32.gmra.mxu1 %vm394_vm0, %v367_v48 }
  0x4a   : > { %889 = vperm.xlu1 %1738, %v781_v49   ;;  %884 = vperm.xlu0 %1737, %v780_v50  }
  0x4b   : > { %1618 = vmatprep.mubr.msk.f32.mxu0 %vm394_vm0, %v348_v51  ;;  %1648 = vmatprep.mubr.msk.f32.mxu1 %vm394_vm0, %v368_v52 }
  0x4d   : > { %1619 = vmatmul.mubr.msk.f32.gmra.mxu0 %vm394_vm0, %v349_v53  ;;  %1649 = vmatmul.mubr.msk.f32.gmra.mxu1 %vm394_vm0, %v369_v54 }
  0x4e   : > { %899 = vperm.xlu1 %1738, %v783_v55   ;;  %894 = vperm.xlu0 %1737, %v782_v56  }
  0x4f   : > { %1621 = vmatprep.mubr.msk.f32.mxu0 %vm394_vm0, %v350_v57  ;;  %1651 = vmatprep.mubr.msk.f32.mxu1 %vm394_vm0, %v370_v58 }
  0x51   : > { %1622 = vmatmul.mubr.msk.f32.gmra.mxu0 %vm394_vm0, %v351_v59  ;;  %1652 = vmatmul.mubr.msk.f32.gmra.mxu1 %vm394_vm0, %v371_v60 }
  0x52   : > { %909 = vperm.xlu1 %1738, %v785_v61   ;;  %904 = vperm.xlu0 %1737, %v784_v62  }
  0x53   : > { %1624 = vmatprep.mubr.msk.f32.mxu0 %vm394_vm0, %v352_v63  ;;  %1654 = vmatprep.mubr.msk.f32.mxu1 %vm394_vm0, %v372_v0 }
  0x55   : > { %1625 = vmatmul.mubr.msk.f32.gmra.mxu0 %vm394_vm0, %v353_v1  ;;  %1655 = vmatmul.mubr.msk.f32.gmra.mxu1 %vm394_vm0, %v373_v2  ;;  %v2177_v1 = vld [vmem:[%s342_s12] ss:$0 sm:$0xff] }
  0x56   : > { %919 = vperm.xlu1 %1738, %v787_v3   ;;  %914 = vperm.xlu0 %1737, %v786_v4  }
  0x57   : > { %1627 = vmatprep.mubr.msk.f32.mxu0 %vm394_vm0, %v354_v5  ;;  %1657 = vmatprep.mubr.msk.f32.mxu1 %vm394_vm0, %v374_v6 }
  0x59   : > { %1628 = vmatmul.mubr.msk.f32.gmra.mxu0 %vm394_vm0, %v355_v7  ;;  %1658 = vmatmul.mubr.msk.f32.gmra.mxu1 %vm394_vm0, %v375_v8 }
  0x5a   : > { %929 = vperm.xlu1 %1738, %v789_v9   ;;  %924 = vperm.xlu0 %1737, %v788_v10  }
  0x5b   : > { %1630 = vmatprep.mubr.msk.f32.mxu0 %vm394_vm0, %v356_v11  ;;  %1660 = vmatprep.mubr.msk.f32.mxu1 %vm394_vm0, %v376_v12 }
  0x5d   : > { %1631 = vmatmul.mubr.msk.f32.gmra.mxu0 %vm394_vm0, %v357_v13  ;;  %1661 = vmatmul.mubr.msk.f32.gmra.mxu1 %vm394_vm0, %v377_v14 }
  0x5e   : > { %939 = vperm.xlu1 %1738, %v791_v15   ;;  %934 = vperm.xlu0 %1737, %v790_v16  }
  0x5f   : > { %1633 = vmatprep.mubr.msk.f32.mxu0 %vm394_vm0, %v358_v17  ;;  %1663 = vmatprep.mubr.msk.f32.mxu1 %vm394_vm0, %v378_v18 }
  0x61   : > { %1634 = vmatmul.mubr.msk.f32.gmra.mxu0 %vm394_vm0, %v359_v19  ;;  %1664 = vmatmul.mubr.msk.f32.gmra.mxu1 %vm394_vm0, %v379_v20 }
  0x62   : > { %949 = vperm.xlu1 %1738, %v793_v21   ;;  %944 = vperm.xlu0 %1737, %v792_v22  }
  0x63   : > { %1636 = vmatprep.mubr.msk.f32.mxu0 %vm394_vm0, %v360_v23  ;;  %1666 = vmatprep.mubr.msk.f32.mxu1 %vm394_vm0, %v380_v24 }
  0x65   : > { %1637 = vmatmul.mubr.msk.f32.gmra.mxu0 %vm394_vm0, %v361_v25  ;;  %1667 = vmatmul.mubr.msk.f32.gmra.mxu1 %vm394_vm0, %v381_v26 }
  0x66   : > { %959 = vperm.xlu1 %1738, %v795_v27   ;;  %954 = vperm.xlu0 %1737, %v794_v28  }
  0x67   : > { %1639 = vmatprep.mubr.msk.f32.mxu0 %vm394_vm0, %v362_v29 }
  0x69   : > { %1640 = vmatmul.mubr.msk.f32.gmra.mxu0 %vm394_vm0, %v363_v30 }
  0x6a   : > { %969 = vperm.xlu1 %1738, %v797_v31   ;;  %964 = vperm.xlu0 %1737, %v796_v32  }
  0x6e   : > { %979 = vperm.xlu1 %1738, %v799_v33   ;;  %974 = vperm.xlu0 %1737, %v798_v34  }
  0x72   : > { %989 = vperm.xlu1 %1738, %v801_v35   ;;  %984 = vperm.xlu0 %1737, %v800_v36  }
  0xa0   : > { %v2138_v37 = vpop.permute.xlu1 %814  ;;  %v805_v38 = vpop.permute.xlu0 %804 }
  0xa4   : > { %v820_v39 = vpop.permute.xlu1 %819  ;;  %v810_v40 = vpop.permute.xlu0 %809 }
  0xa8   : > { %v2140_v41 = vpop.permute.xlu1 %829  ;;  %v2142_v42 = vpop.permute.xlu0 %824 }
  0xac   : > { %v2144_v43 = vpop.permute.xlu1 %839  ;;  %v2146_v44 = vpop.permute.xlu0 %834 }
  0xb1   : > { %v2148_v45 = vpop.permute.xlu1 %849  ;;  %v2150_v46 = vpop.permute.xlu0 %844 }
  0xb6   : > { %v2152_v47 = vpop.permute.xlu1 %859  ;;  %v2154_v48 = vpop.permute.xlu0 %854 }
  0xbb   : > { %v2156_v49 = vpop.permute.xlu1 %869  ;;  %v2158_v50 = vpop.permute.xlu0 %864 }
  0xc1   : > { %v2160_v51 = vpop.permute.xlu1 %879  ;;  %v2162_v52 = vpop.permute.xlu0 %874 }
  0xc5   : > { %v2164_v53 = vpop.permute.xlu1 %889  ;;  %v2166_v54 = vpop.permute.xlu0 %884 }
  0xc9   : > { %v2168_v55 = vpop.permute.xlu1 %899  ;;  %v2170_v56 = vpop.permute.xlu0 %894 }
  0xcd   : > { %v910_v57 = vpop.permute.xlu1 %909  ;;  %v905_v58 = vpop.permute.xlu0 %904 }
  0xd1   : > { %v920_v59 = vpop.permute.xlu1 %919  ;;  %v915_v62 = vpop.permute.xlu0 %914 }
  0xd5   : > { %v930_v10 = vpop.permute.xlu1 %929  ;;  %v925_v19 = vpop.permute.xlu0 %924 }
 0x105   : > { %v1614_v60 = vpop.f32.mrf.mxu0  ;;  %v1644_v61 = vpop.f32.mrf.mxu1 }
 0x106   : > { %v581_v63 = vadd.f32 2.25, %v1614_v60  ;;  %v681_v0 = vadd.f32 2.25, %v1644_v61 }
 0x107   : > { %v575_v2 = vpop.f32.mrf.mxu0  ;;  %v675_v3 = vpop.f32.mrf.mxu1 }
 0x108   : > { %v993_v4 = vmul.f32 %v810_v40, %v581_v63  ;;  %v1013_v5 = vmul.f32 %v910_v57, %v681_v0  ;;  %v576_v6 = vadd.f32 2.25, %v575_v2  ;;  %v676_v7 = vadd.f32 2.25, %v675_v3 }
 0x109   : > { %v1617_v8 = vpop.f32.mrf.mxu0  ;;  %v1647_v9 = vpop.f32.mrf.mxu1 }
 0x10a   : > { %v1038_v11 = vmul.f32 %v2177_v1, %v993_v4  ;;  %v1058_v12 = vmul.f32 %v2177_v1, %v1013_v5  ;;  %v992_v13 = vmul.f32 %v805_v38, %v576_v6  ;;  %v1012_v14 = vmul.f32 %v905_v58, %v676_v7  ;;  %v935_v4 = vpop.permute.xlu0 %934 }
 0x10b   : > { %v591_v15 = vadd.f32 2.25, %v1617_v8  ;;  %v691_v16 = vadd.f32 2.25, %v1647_v9  ;;  %v585_v17 = vpop.f32.mrf.mxu0  ;;  %v685_v18 = vpop.f32.mrf.mxu1 }
 0x10c   : > { %v1076_v20 = vmul.f32 %v1038_v11, %v1038_v11  ;;  %v1096_v21 = vmul.f32 %v1058_v12, %v1058_v12  ;;  %v1037_v22 = vmul.f32 %v2177_v1, %v992_v13  ;;  %v1057_v23 = vmul.f32 %v2177_v1, %v1012_v14 }
 0x10d   : > { %v995_v24 = vmul.f32 %v820_v39, %v591_v15  ;;  %v1015_v25 = vmul.f32 %v920_v59, %v691_v16  ;;  %v586_v26 = vadd.f32 2.25, %v585_v17  ;;  %v686_v27 = vadd.f32 2.25, %v685_v18  ;;  %v1620_v28 = vpop.f32.mrf.mxu0  ;;  %v1650_v29 = vpop.f32.mrf.mxu1 }
 0x10e   : > { %v1114_v30 = vmul.f32 %v1076_v20, %v1038_v11  ;;  %v1134_v31 = vmul.f32 %v1096_v21, %v1058_v12  ;;  %v1075_v32 = vmul.f32 %v1037_v22, %v1037_v22  ;;  %v1095_v33 = vmul.f32 %v1057_v23, %v1057_v23  ;;  %v940_v39 = vpop.permute.xlu1 %939 }
 0x10f   : > { %v1040_v34 = vmul.f32 %v2177_v1, %v995_v24  ;;  %v1060_v35 = vmul.f32 %v2177_v1, %v1015_v25  ;;  %v994_v36 = vmul.f32 %v2138_v37, %v586_v26  ;;  %v1014_v38 = vmul.f32 %v915_v62, %v686_v27  ;;  %v595_v40 = vpop.f32.mrf.mxu0  ;;  %v695_v57 = vpop.f32.mrf.mxu1 }
 0x110   : > { %1152 = vst [vmem:[%s2191_s15 + $0x8] sm:$0xff] %v1114_v30  ;;  %1172 = vst [vmem:[%s2191_s15 + $0xa8] sm:$0xff] %v1134_v31  ;;  %v1113_v58 = vmul.f32 %v1075_v32, %v1037_v22  ;;  %v1133_v59 = vmul.f32 %v1095_v33, %v1057_v23  ;;  %v601_v60 = vadd.f32 2.25, %v1620_v28  ;;  %v701_v61 = vadd.f32 2.25, %v1650_v29 }
 0x111   : > { %v1078_v63 = vmul.f32 %v1040_v34, %v1040_v34  ;;  %v1098_v0 = vmul.f32 %v1060_v35, %v1060_v35  ;;  %v1039_v37 = vmul.f32 %v2177_v1, %v994_v36  ;;  %v1059_v62 = vmul.f32 %v2177_v1, %v1014_v38  ;;  %v1623_v2 = vpop.f32.mrf.mxu0  ;;  %v1653_v3 = vpop.f32.mrf.mxu1 }
 0x112   : > { %1151 = vst [vmem:[%s2191_s15] sm:$0xff] %v1113_v58  ;;  %1171 = vst [vmem:[%s2191_s15 + $0xa0] sm:$0xff] %v1133_v59  ;;  %v997_v5 = vmul.f32 %v2140_v41, %v601_v60  ;;  %v1017_v6 = vmul.f32 %v930_v10, %v701_v61  ;;  %v596_v7 = vadd.f32 2.25, %v595_v40  ;;  %v696_v8 = vadd.f32 2.25, %v695_v57  ;;  %v950_v25 = vpop.permute.xlu1 %949 }
 0x113   : > { %v1116_v9 = vmul.f32 %v1078_v63, %v1040_v34  ;;  %v1136_v11 = vmul.f32 %v1098_v0, %v1060_v35  ;;  %v1077_v12 = vmul.f32 %v1039_v37, %v1039_v37  ;;  %v1097_v13 = vmul.f32 %v1059_v62, %v1059_v62  ;;  %v605_v14 = vpop.f32.mrf.mxu0  ;;  %v705_v15 = vpop.f32.mrf.mxu1 }
 0x114   : > { %v1042_v16 = vmul.f32 %v2177_v1, %v997_v5  ;;  %v1062_v17 = vmul.f32 %v2177_v1, %v1017_v6  ;;  %v996_v18 = vmul.f32 %v2142_v42, %v596_v7  ;;  %v1016_v20 = vmul.f32 %v925_v19, %v696_v8  ;;  %v945_v34 = vpop.permute.xlu0 %944 }
 0x115   : > { %1154 = vst [vmem:[%s2191_s15 + $0x18] sm:$0xff] %v1116_v9  ;;  %1174 = vst [vmem:[%s2191_s15 + $0xb8] sm:$0xff] %v1136_v11  ;;  %v1115_v41 = vmul.f32 %v1077_v12, %v1039_v37  ;;  %v1135_v10 = vmul.f32 %v1097_v13, %v1059_v62  ;;  %v611_v21 = vadd.f32 2.25, %v1623_v2  ;;  %v711_v22 = vadd.f32 2.25, %v1653_v3  ;;  %v1626_v23 = vpop.f32.mrf.mxu0  ;;  %v1656_v24 = vpop.f32.mrf.mxu1 }
 0x116   : > { %v1080_v26 = vmul.f32 %v1042_v16, %v1042_v16  ;;  %v1100_v27 = vmul.f32 %v1062_v17, %v1062_v17  ;;  %v1041_v28 = vmul.f32 %v2177_v1, %v996_v18  ;;  %v1061_v29 = vmul.f32 %v2177_v1, %v1016_v20 }
 0x117   : > { %1153 = vst [vmem:[%s2191_s15 + $0x10] sm:$0xff] %v1115_v41  ;;  %1173 = vst [vmem:[%s2191_s15 + $0xb0] sm:$0xff] %v1135_v10  ;;  %v999_v42 = vmul.f32 %v2144_v43, %v611_v21  ;;  %v1019_v19 = vmul.f32 %v940_v39, %v711_v22  ;;  %v606_v30 = vadd.f32 2.25, %v605_v14  ;;  %v706_v31 = vadd.f32 2.25, %v705_v15  ;;  %v615_v32 = vpop.f32.mrf.mxu0  ;;  %v715_v33 = vpop.f32.mrf.mxu1 }
 0x118   : > { %v1118_v35 = vmul.f32 %v1080_v26, %v1042_v16  ;;  %v1138_v36 = vmul.f32 %v1100_v27, %v1062_v17  ;;  %v1079_v38 = vmul.f32 %v1041_v28, %v1041_v28  ;;  %v1099_v40 = vmul.f32 %v1061_v29, %v1061_v29  ;;  %v955_v18 = vpop.permute.xlu0 %954 }
 0x119   : > { %v1044_v57 = vmul.f32 %v2177_v1, %v999_v42  ;;  %v1064_v58 = vmul.f32 %v2177_v1, %v1019_v19  ;;  %v998_v59 = vmul.f32 %v2146_v44, %v606_v30  ;;  %v1018_v60 = vmul.f32 %v935_v4, %v706_v31  ;;  %v1629_v43 = vpop.f32.mrf.mxu0  ;;  %v1659_v39 = vpop.f32.mrf.mxu1 }
 0x11a   : > { %1156 = vst [vmem:[%s2191_s15 + $0x28] sm:$0xff] %v1118_v35  ;;  %1176 = vst [vmem:[%s2191_s15 + $0xc8] sm:$0xff] %v1138_v36  ;;  %v1117_v61 = vmul.f32 %v1079_v38, %v1041_v28  ;;  %v1137_v63 = vmul.f32 %v1099_v40, %v1061_v29  ;;  %v621_v0 = vadd.f32 2.25, %v1626_v23  ;;  %v721_v37 = vadd.f32 2.25, %v1656_v24  ;;  %v960_v44 = vpop.permute.xlu1 %959 }
 0x11b   : > { %v1082_v62 = vmul.f32 %v1044_v57, %v1044_v57  ;;  %v1102_v2 = vmul.f32 %v1064_v58, %v1064_v58  ;;  %v1043_v3 = vmul.f32 %v2177_v1, %v998_v59  ;;  %v1063_v5 = vmul.f32 %v2177_v1, %v1018_v60  ;;  %v625_v6 = vpop.f32.mrf.mxu0  ;;  %v725_v7 = vpop.f32.mrf.mxu1 }
 0x11c   : > { %1155 = vst [vmem:[%s2191_s15 + $0x20] sm:$0xff] %v1117_v61  ;;  %1175 = vst [vmem:[%s2191_s15 + $0xc0] sm:$0xff] %v1137_v63  ;;  %v1001_v4 = vmul.f32 %v2148_v45, %v621_v0  ;;  %v1021_v8 = vmul.f32 %v950_v25, %v721_v37  ;;  %v616_v9 = vadd.f32 2.25, %v615_v32  ;;  %v716_v11 = vadd.f32 2.25, %v715_v33 }
 0x11d   : > { %v1120_v12 = vmul.f32 %v1082_v62, %v1044_v57  ;;  %v1140_v13 = vmul.f32 %v1102_v2, %v1064_v58  ;;  %v1081_v14 = vmul.f32 %v1043_v3, %v1043_v3  ;;  %v1101_v15 = vmul.f32 %v1063_v5, %v1063_v5  ;;  %v1632_v16 = vpop.f32.mrf.mxu0  ;;  %v1662_v17 = vpop.f32.mrf.mxu1 }
 0x11e   : > { %v1046_v20 = vmul.f32 %v2177_v1, %v1001_v4  ;;  %v1066_v41 = vmul.f32 %v2177_v1, %v1021_v8  ;;  %v1000_v10 = vmul.f32 %v2150_v46, %v616_v9  ;;  %v1020_v45 = vmul.f32 %v945_v34, %v716_v11  ;;  %v970_v40 = vpop.permute.xlu1 %969 }
 0x11f   : > { %1158 = vst [vmem:[%s2191_s15 + $0x38] sm:$0xff] %v1120_v12  ;;  %1178 = vst [vmem:[%s2191_s15 + $0xd8] sm:$0xff] %v1140_v13  ;;  %v1119_v21 = vmul.f32 %v1081_v14, %v1043_v3  ;;  %v1139_v22 = vmul.f32 %v1101_v15, %v1063_v5  ;;  %v631_v23 = vadd.f32 2.25, %v1629_v43  ;;  %v731_v24 = vadd.f32 2.25, %v1659_v39  ;;  %v635_v25 = vpop.f32.mrf.mxu0  ;;  %v735_v26 = vpop.f32.mrf.mxu1 }
 0x120   : > { %v1084_v27 = vmul.f32 %v1046_v20, %v1046_v20  ;;  %v1104_v28 = vmul.f32 %v1066_v41, %v1066_v41  ;;  %v1045_v29 = vmul.f32 %v2177_v1, %v1000_v10  ;;  %v1065_v42 = vmul.f32 %v2177_v1, %v1020_v45  ;;  %v965_v43 = vpop.permute.xlu0 %964 }
 0x121   : > { %1157 = vst [vmem:[%s2191_s15 + $0x30] sm:$0xff] %v1119_v21  ;;  %1177 = vst [vmem:[%s2191_s15 + $0xd0] sm:$0xff] %v1139_v22  ;;  %v1003_v19 = vmul.f32 %v2152_v47, %v631_v23  ;;  %v1023_v46 = vmul.f32 %v960_v44, %v731_v24  ;;  %v626_v30 = vadd.f32 2.25, %v625_v6  ;;  %v726_v31 = vadd.f32 2.25, %v725_v7  ;;  %v1635_v32 = vpop.f32.mrf.mxu0  ;;  %v1665_v33 = vpop.f32.mrf.mxu1 }
 0x122   : > { %v1122_v34 = vmul.f32 %v1084_v27, %v1046_v20  ;;  %v1142_v35 = vmul.f32 %v1104_v28, %v1066_v41  ;;  %v1083_v36 = vmul.f32 %v1045_v29, %v1045_v29  ;;  %v1103_v38 = vmul.f32 %v1065_v42, %v1065_v42 }
 0x123   : > { %v1048_v57 = vmul.f32 %v2177_v1, %v1003_v19  ;;  %v1068_v58 = vmul.f32 %v2177_v1, %v1023_v46  ;;  %v1002_v59 = vmul.f32 %v2154_v48, %v626_v30  ;;  %v1022_v47 = vmul.f32 %v955_v18, %v726_v31  ;;  %v645_v60 = vpop.f32.mrf.mxu0  ;;  %v745_v5 = vpop.f32.mrf.mxu1 }
 0x124   : > { %1160 = vst [vmem:[%s2191_s15 + $0x48] sm:$0xff] %v1122_v34  ;;  %1180 = vst [vmem:[%s2191_s15 + $0xe8] sm:$0xff] %v1142_v35  ;;  %v1121_v39 = vmul.f32 %v1083_v36, %v1045_v29  ;;  %v1141_v61 = vmul.f32 %v1103_v38, %v1065_v42  ;;  %v641_v63 = vadd.f32 2.25, %v1632_v16  ;;  %v741_v0 = vadd.f32 2.25, %v1662_v17  ;;  %v980_v18 = vpop.permute.xlu1 %979 }
 0x125   : > { %v1086_v37 = vmul.f32 %v1048_v57, %v1048_v57  ;;  %v1106_v62 = vmul.f32 %v1068_v58, %v1068_v58  ;;  %v1047_v2 = vmul.f32 %v2177_v1, %v1002_v59  ;;  %v1067_v3 = vmul.f32 %v2177_v1, %v1022_v47  ;;  %v1638_v6 = vpop.f32.mrf.mxu0  ;;  %v1668_v45 = vpop.f32.mrf.mxu1 }
 0x126   : > { %1159 = vst [vmem:[%s2191_s15 + $0x40] sm:$0xff] %v1121_v39  ;;  %1179 = vst [vmem:[%s2191_s15 + $0xe0] sm:$0xff] %v1141_v61  ;;  %v1005_v48 = vmul.f32 %v2156_v49, %v641_v63  ;;  %v1025_v7 = vmul.f32 %v970_v40, %v741_v0  ;;  %v636_v44 = vadd.f32 2.25, %v635_v25  ;;  %v736_v4 = vadd.f32 2.25, %v735_v26  ;;  %v975_v25 = vpop.permute.xlu0 %974 }
 0x127   : > { %v1124_v8 = vmul.f32 %v1086_v37, %v1048_v57  ;;  %v1144_v9 = vmul.f32 %v1106_v62, %v1068_v58  ;;  %v1085_v11 = vmul.f32 %v1047_v2, %v1047_v2  ;;  %v1105_v12 = vmul.f32 %v1067_v3, %v1067_v3  ;;  %v655_v17 = vpop.f32.mrf.mxu0  ;;  %v755_v35 = vpop.f32.mrf.mxu1 }
 0x128   : > { %v1050_v13 = vmul.f32 %v2177_v1, %v1005_v48  ;;  %v1070_v14 = vmul.f32 %v2177_v1, %v1025_v7  ;;  %v1004_v15 = vmul.f32 %v2158_v50, %v636_v44  ;;  %v1024_v16 = vmul.f32 %v965_v43, %v736_v4  ;;  %v990_v57 = vpop.permute.xlu1 %989 }
 0x129   : > { %1162 = vst [vmem:[%s2191_s15 + $0x58] sm:$0xff] %v1124_v8  ;;  %1182 = vst [vmem:[%s2191_s15 + $0xf8] sm:$0xff] %v1144_v9  ;;  %v1123_v49 = vmul.f32 %v1085_v11, %v1047_v2  ;;  %v1143_v20 = vmul.f32 %v1105_v12, %v1067_v3  ;;  %v651_v41 = vadd.f32 2.25, %v1635_v32  ;;  %v751_v10 = vadd.f32 2.25, %v1665_v33  ;;  %v1641_v30 = vpop.f32.mrf.mxu0 }
 0x12a   : > { %v1088_v21 = vmul.f32 %v1050_v13, %v1050_v13  ;;  %v1108_v22 = vmul.f32 %v1070_v14, %v1070_v14  ;;  %v1049_v23 = vmul.f32 %v2177_v1, %v1004_v15  ;;  %v1069_v24 = vmul.f32 %v2177_v1, %v1024_v16  ;;  %v985_v0 = vpop.permute.xlu0 %984 }
 0x12b   : > { %1161 = vst [vmem:[%s2191_s15 + $0x50] sm:$0xff] %v1123_v49  ;;  %1181 = vst [vmem:[%s2191_s15 + $0xf0] sm:$0xff] %v1143_v20  ;;  %v1007_v50 = vmul.f32 %v2160_v51, %v651_v41  ;;  %v1027_v26 = vmul.f32 %v980_v18, %v751_v10  ;;  %v646_v27 = vadd.f32 2.25, %v645_v60  ;;  %v746_v28 = vadd.f32 2.25, %v745_v5  ;;  %v665_v63 = vpop.f32.mrf.mxu0 }
 0x12c   : > { %v1126_v29 = vmul.f32 %v1088_v21, %v1050_v13  ;;  %v1146_v42 = vmul.f32 %v1108_v22, %v1070_v14  ;;  %v1087_v19 = vmul.f32 %v1049_v23, %v1049_v23  ;;  %v1107_v46 = vmul.f32 %v1069_v24, %v1069_v24  ;;  %v1305_v22 = vld [vmem:[%s2191_s15 + $0x8] sm:$0xff] (%p1840_p6) }
 0x12d   : > { %v1052_v31 = vmul.f32 %v2177_v1, %v1007_v50  ;;  %v1072_v32 = vmul.f32 %v2177_v1, %v1027_v26  ;;  %v1006_v33 = vmul.f32 %v2162_v52, %v646_v27  ;;  %v1026_v34 = vmul.f32 %v975_v25, %v746_v28  ;;  %v1311_v25 = vld [vmem:[%s2191_s15 + $0x20] sm:$0xff] (%p1840_p6)  ;;  %v1313_v50 = vld [vmem:[%s2191_s15 + $0x28] sm:$0xff] (%p1840_p6)  ;;  %1306 = vst [vmem:[%s2288_s22 + $0x10] sm:$0xff] (%p1840_p6), %v1305_v22  ;;  %v1315_v26 = vld [vmem:[%s2191_s15 + $0x30] sm:$0xff] (%p1840_p6) }
 0x12e   : > { %1164 = vst [vmem:[%s2191_s15 + $0x68] sm:$0xff] %v1126_v29  ;;  %1184 = vst [vmem:[%s2191_s15 + $0x108] sm:$0xff] %v1146_v42  ;;  %v1125_v51 = vmul.f32 %v1087_v19, %v1049_v23  ;;  %v1145_v36 = vmul.f32 %v1107_v46, %v1069_v24  ;;  %v661_v38 = vadd.f32 2.25, %v1638_v6  ;;  %v761_v40 = vadd.f32 2.25, %v1668_v45  ;;  %v1307_v23 = vld [vmem:[%s2191_s15 + $0x10] sm:$0xff] (%p1840_p6)  ;;  %v1309_v24 = vld [vmem:[%s2191_s15 + $0x18] sm:$0xff] (%p1840_p6) }
 0x12f   : > { %v1090_v58 = vmul.f32 %v1052_v31, %v1052_v31  ;;  %v1110_v59 = vmul.f32 %v1072_v32, %v1072_v32  ;;  %v1051_v47 = vmul.f32 %v2177_v1, %v1006_v33  ;;  %v1071_v60 = vmul.f32 %v2177_v1, %v1026_v34  ;;  %1308 = vst [vmem:[%s2288_s22 + $0x20] sm:$0xff] (%p1840_p6), %v1307_v23  ;;  %v1317_v27 = vld [vmem:[%s2191_s15 + $0x38] sm:$0xff] (%p1840_p6)  ;;  %v1319_v28 = vld [vmem:[%s2191_s15 + $0x40] sm:$0xff] (%p1840_p6)  ;;  %v1321_v29 = vld [vmem:[%s2191_s15 + $0x48] sm:$0xff] (%p1840_p6) }
 0x130   : > { %1163 = vst [vmem:[%s2191_s15 + $0x60] sm:$0xff] %v1125_v51  ;;  %1183 = vst [vmem:[%s2191_s15 + $0x100] sm:$0xff] %v1145_v36  ;;  %v1009_v52 = vmul.f32 %v2164_v53, %v661_v38  ;;  %v1029_v43 = vmul.f32 %v990_v57, %v761_v40  ;;  %v656_v39 = vadd.f32 2.25, %v655_v17  ;;  %v756_v61 = vadd.f32 2.25, %v755_v35  ;;  %v1325_v19 = vld [vmem:[%s2191_s15 + $0x58] sm:$0xff] (%p1840_p6)  ;;  %v1343_v36 = vld [vmem:[%s2191_s15 + $0xa0] sm:$0xff] (%p1840_p6) }
 0x131   : > { %v1128_v37 = vmul.f32 %v1090_v58, %v1052_v31  ;;  %v1148_v62 = vmul.f32 %v1110_v59, %v1072_v32  ;;  %v1089_v2 = vmul.f32 %v1051_v47, %v1051_v47  ;;  %v1109_v3 = vmul.f32 %v1071_v60, %v1071_v60  ;;  %1310 = vst [vmem:[%s2288_s22 + $0x30] sm:$0xff] (%p1840_p6), %v1309_v24  ;;  %v1345_v38 = vld [vmem:[%s2191_s15 + $0xa8] sm:$0xff] (%p1840_p6)  ;;  %v1347_v40 = vld [vmem:[%s2191_s15 + $0xb0] sm:$0xff] (%p1840_p6)  ;;  %v1349_v57 = vld [vmem:[%s2191_s15 + $0xb8] sm:$0xff] (%p1840_p6) }
 0x132   : > { %v1054_v5 = vmul.f32 %v2177_v1, %v1009_v52  ;;  %v1074_v6 = vmul.f32 %v2177_v1, %v1029_v43  ;;  %v1008_v48 = vmul.f32 %v2166_v54, %v656_v39  ;;  %v1028_v7 = vmul.f32 %v985_v0, %v756_v61  ;;  %1312 = vst [vmem:[%s2288_s22 + $0x40] sm:$0xff] (%p1840_p6), %v1311_v25  ;;  %v1323_v42 = vld [vmem:[%s2191_s15 + $0x50] sm:$0xff] (%p1840_p6)  ;;  %v1351_v58 = vld [vmem:[%s2191_s15 + $0xc0] sm:$0xff] (%p1840_p6)  ;;  %v1353_v59 = vld [vmem:[%s2191_s15 + $0xc8] sm:$0xff] (%p1840_p6) }
 0x133   : > { %1166 = vst [vmem:[%s2191_s15 + $0x78] sm:$0xff] %v1128_v37  ;;  %1186 = vst [vmem:[%s2191_s15 + $0x118] sm:$0xff] %v1148_v62  ;;  %v1127_v53 = vmul.f32 %v1089_v2, %v1051_v47  ;;  %v1147_v44 = vmul.f32 %v1109_v3, %v1071_v60  ;;  %v671_v4 = vadd.f32 2.25, %v1641_v30  ;;  %v666_v8 = vadd.f32 2.25, %v665_v63  ;;  %v1355_v47 = vld [vmem:[%s2191_s15 + $0xd0] sm:$0xff] (%p1840_p6)  ;;  %v1357_v60 = vld [vmem:[%s2191_s15 + $0xd8] sm:$0xff] (%p1840_p6) }
 0x134   : > { %v1092_v9 = vmul.f32 %v1054_v5, %v1054_v5  ;;  %v1112_v11 = vmul.f32 %v1074_v6, %v1074_v6  ;;  %v1053_v12 = vmul.f32 %v2177_v1, %v1008_v48  ;;  %v1073_v13 = vmul.f32 %v2177_v1, %v1028_v7  ;;  %1314 = vst [vmem:[%s2288_s22 + $0x50] sm:$0xff] (%p1840_p6), %v1313_v50  ;;  %v1359_v52 = vld [vmem:[%s2191_s15 + $0xe0] sm:$0xff] (%p1840_p6)  ;;  %v1361_v43 = vld [vmem:[%s2191_s15 + $0xe8] sm:$0xff] (%p1840_p6)  ;;  %v1363_v39 = vld [vmem:[%s2191_s15 + $0xf0] sm:$0xff] (%p1840_p6) }
 0x135   : > { %1165 = vst [vmem:[%s2191_s15 + $0x70] sm:$0xff] %v1127_v53  ;;  %1185 = vst [vmem:[%s2191_s15 + $0x110] sm:$0xff] %v1147_v44  ;;  %v1011_v54 = vmul.f32 %v2168_v55, %v671_v4  ;;  %v1010_v14 = vmul.f32 %v2170_v56, %v666_v8  ;;  %v1329_v30 = vld [vmem:[%s2191_s15 + $0x68] sm:$0xff] (%p1840_p6)  ;;  %v1365_v61 = vld [vmem:[%s2191_s15 + $0xf8] sm:$0xff] (%p1840_p6) }
 0x136   : > { %v1130_v15 = vmul.f32 %v1092_v9, %v1054_v5  ;;  %v1150_v16 = vmul.f32 %v1112_v11, %v1074_v6  ;;  %v1091_v17 = vmul.f32 %v1053_v12, %v1053_v12  ;;  %v1111_v18 = vmul.f32 %v1073_v13, %v1073_v13  ;;  %1316 = vst [vmem:[%s2288_s22 + $0x60] sm:$0xff] (%p1840_p6), %v1315_v26  ;;  %v1369_v0 = vld [vmem:[%s2191_s15 + $0x108] sm:$0xff] (%p1840_p6) }
 0x137   : > { %v1056_v49 = vmul.f32 %v2177_v1, %v1011_v54  ;;  %v1055_v20 = vmul.f32 %v2177_v1, %v1010_v14  ;;  %v1303_v1 = vld [vmem:[%s2191_s15] sm:$0xff] (%p1840_p6)  ;;  %1318 = vst [vmem:[%s2288_s22 + $0x70] sm:$0xff] (%p1840_p6), %v1317_v27  ;;  %1320 = vst [vmem:[%s2288_s22 + $0x80] sm:$0xff] (%p1840_p6), %v1319_v28 }
 0x138   : > { %1168 = vst [vmem:[%s2191_s15 + $0x88] sm:$0xff] %v1130_v15  ;;  %1188 = vst [vmem:[%s2191_s15 + $0x128] sm:$0xff] %v1150_v16  ;;  %v1129_v41 = vmul.f32 %v1091_v17, %v1053_v12  ;;  %v1149_v10 = vmul.f32 %v1111_v18, %v1073_v13  ;;  %v1327_v46 = vld [vmem:[%s2191_s15 + $0x60] sm:$0xff] (%p1840_p6) }
 0x139   : > { %v1094_v45 = vmul.f32 %v1056_v49, %v1056_v49  ;;  %v1093_v21 = vmul.f32 %v1055_v20, %v1055_v20  ;;  %1195 = sbr.rel (!%p1840_p6) target bundleno = 330 (0x14a), region = 78  ;;  %1304 = vst [vmem:[%s2288_s22] sm:$0xff] (%p1840_p6), %v1303_v1  ;;  %1322 = vst [vmem:[%s2288_s22 + $0x90] sm:$0xff] (%p1840_p6), %v1321_v29  ;;  %v1367_v63 = vld [vmem:[%s2191_s15 + $0x100] sm:$0xff] (%p1840_p6) }
 0x13a   : > { %1167 = vst [vmem:[%s2191_s15 + $0x80] sm:$0xff] %v1129_v41  ;;  %1187 = vst [vmem:[%s2191_s15 + $0x120] sm:$0xff] %v1149_v10  ;;  %v1333_v32 = vld [vmem:[%s2191_s15 + $0x78] sm:$0xff] (%p1840_p6) }
 0x13b   : > { %v1132_v55 = vmul.f32 %v1094_v45, %v1056_v49  ;;  %v1131_v56 = vmul.f32 %v1093_v21, %v1055_v20  ;;  %1324 = vst [vmem:[%s2288_s22 + $0xa0] sm:$0xff] (%p1840_p6), %v1323_v42  ;;  %1326 = vst [vmem:[%s2288_s22 + $0xb0] sm:$0xff] (%p1840_p6), %v1325_v19  ;;  %v1373_v62 = vld [vmem:[%s2191_s15 + $0x118] sm:$0xff] (%p1840_p6) }
 0x13c   : > { %v1331_v31 = vld [vmem:[%s2191_s15 + $0x70] sm:$0xff] (%p1840_p6)  ;;  %1328 = vst [vmem:[%s2288_s22 + $0xc0] sm:$0xff] (%p1840_p6), %v1327_v46  ;;  %1330 = vst [vmem:[%s2288_s22 + $0xd0] sm:$0xff] (%p1840_p6), %v1329_v30 }
 0x13d   : > { %1170 = vst [vmem:[%s2191_s15 + $0x98] sm:$0xff] %v1132_v55  ;;  %1169 = vst [vmem:[%s2191_s15 + $0x90] sm:$0xff] %v1131_v56  ;;  %v1371_v37 = vld [vmem:[%s2191_s15 + $0x110] sm:$0xff] (%p1840_p6) }
 0x13e   : > { %1332 = vst [vmem:[%s2288_s22 + $0xe0] sm:$0xff] %v1331_v31  ;;  %1334 = vst [vmem:[%s2288_s22 + $0xf0] sm:$0xff] %v1333_v32 }
 0x13f   : > { %v1337_v34 = vld [vmem:[%s2191_s15 + $0x88] sm:$0xff]  ;;  %1344 = vst [vmem:[%s2288_s22 + $0x140] sm:$0xff] %v1343_v36  ;;  %1346 = vst [vmem:[%s2288_s22 + $0x150] sm:$0xff] %v1345_v38 }
 0x140   : > { %1338 = vst [vmem:[%s2288_s22 + $0x110] sm:$0xff] %v1337_v34  ;;  %1348 = vst [vmem:[%s2288_s22 + $0x160] sm:$0xff] %v1347_v40  ;;  %v1377_v3 = vld [vmem:[%s2191_s15 + $0x128] sm:$0xff] }
 0x141   : > { %v1335_v33 = vld [vmem:[%s2191_s15 + $0x80] sm:$0xff]  ;;  %1350 = vst [vmem:[%s2288_s22 + $0x170] sm:$0xff] %v1349_v57  ;;  %1352 = vst [vmem:[%s2288_s22 + $0x180] sm:$0xff] %v1351_v58 }
 0x142   : > { %1336 = vst [vmem:[%s2288_s22 + $0x100] sm:$0xff] %v1335_v33  ;;  %1354 = vst [vmem:[%s2288_s22 + $0x190] sm:$0xff] %v1353_v59  ;;  %v1375_v2 = vld [vmem:[%s2191_s15 + $0x120] sm:$0xff] }
 0x143   : > { %1356 = vst [vmem:[%s2288_s22 + $0x1a0] sm:$0xff] %v1355_v47  ;;  %1358 = vst [vmem:[%s2288_s22 + $0x1b0] sm:$0xff] %v1357_v60 }
 0x144   : > { %v1339_v35 = vld [vmem:[%s2191_s15 + $0x90] sm:$0xff]  ;;  %v1341_v51 = vld [vmem:[%s2191_s15 + $0x98] sm:$0xff]  ;;  %1360 = vst [vmem:[%s2288_s22 + $0x1c0] sm:$0xff] %v1359_v52  ;;  %1362 = vst [vmem:[%s2288_s22 + $0x1d0] sm:$0xff] %v1361_v43 }
 0x145   : > { %1340 = vst [vmem:[%s2288_s22 + $0x120] sm:$0xff] %v1339_v35  ;;  %1342 = vst [vmem:[%s2288_s22 + $0x130] sm:$0xff] %v1341_v51 }
 0x146   : > { %1364 = vst [vmem:[%s2288_s22 + $0x1e0] sm:$0xff] %v1363_v39  ;;  %1366 = vst [vmem:[%s2288_s22 + $0x1f0] sm:$0xff] %v1365_v61 }
 0x147   : > { %1368 = vst [vmem:[%s2288_s22 + $0x200] sm:$0xff] %v1367_v63  ;;  %1370 = vst [vmem:[%s2288_s22 + $0x210] sm:$0xff] %v1369_v0 }
 0x148   : > { %1372 = vst [vmem:[%s2288_s22 + $0x220] sm:$0xff] %v1371_v37  ;;  %1374 = vst [vmem:[%s2288_s22 + $0x230] sm:$0xff] %v1373_v62 }
 0x149   : > { %1376 = vst [vmem:[%s2288_s22 + $0x240] sm:$0xff] %v1375_v2  ;;  %1378 = vst [vmem:[%s2288_s22 + $0x250] sm:$0xff] %v1377_v3 }
 0x14a PF: > { %s14_s19 = sadd.s32 1, %s1777_s19   ;;  %s2384_s15 = smov %s1765_s16 }
 0x14b   : > { %p11_p12 = scmp.ge.s32.totalorder %s14_s19, 4   ;;  %s2385_s16 = smov %s1845_s25 }
 0x14c   : > { %s2386_s17 = smov %s1773_s18  ;;  %s2387_s18 = smov %s2389_s20 }
 0x14d   :  { %13 = sbr.rel (!%p11_p12) target bundleno = 3 (0x3), region = 156 }

</bundles_post_ra>
